<compile_context>
chip_gen: v7x
topology: tpu7x:2x2x1
jax: 0.10.0
libtpu: 0.0.40
codegen_flags: <defaults>
</compile_context>

<pallas_src>
import functools

import jax
import jax.numpy as jnp
from jax.experimental import pallas as pl
from jax.experimental.pallas import tpu as pltpu


def _sage_layer_kernel(a_ref, xk_ref, xr_ref, inv_deg_ref, w_ref, wr_ref,
                       b_ref, o_ref, acc_ref, *, apply_relu):
    k = pl.program_id(1)

    @pl.when(k == 0)
    def _init():
        acc_ref[...] = jnp.zeros_like(acc_ref)

    # Partial (un-normalized) neighbor-sum for this (node-tile, k-tile).
    # Binary int8 adjacency is widened to bf16 (VPU); MXU accumulates in f32.
    a_blk = a_ref[...].astype(jnp.bfloat16)
    acc_ref[...] += jnp.dot(a_blk, xk_ref[...],
                            preferred_element_type=jnp.float32)

    @pl.when(k == pl.num_programs(1) - 1)
    def _finalize():
        # Mean aggregation = row-sum * (1/deg), exact f32 normalization.
        agg = (acc_ref[...] * inv_deg_ref[...]).astype(xr_ref.dtype)
        out = jnp.dot(agg, w_ref[...], preferred_element_type=jnp.float32)
        out = out + jnp.dot(xr_ref[...], wr_ref[...],
                            preferred_element_type=jnp.float32)
        out = out + b_ref[...]
        if apply_relu:
            out = jnp.maximum(out, 0.0)
        o_ref[...] = out.astype(o_ref.dtype)


def _pick_tile(n, candidates):
    for c in candidates:
        if c <= n and n % c == 0:
            return c
    return n  # fall back to the full extent (always a legal block size)


def sage_layer(adj_i8, inv_deg, x, w, w_root, bias, *, apply_relu, out_dtype,
               tile_n=None, tile_k=None):
    """One l_SAGE layer (optionally fused with ReLU) via pallas_call."""
    N, F_in = x.shape
    F_out = w.shape[1]
    assert adj_i8.shape == (N, N)
    assert inv_deg.shape == (N, 1)
    assert w.shape == (F_in, F_out) and w_root.shape == (F_in, F_out)

    # 256-row node tiles feed the 2x256x256 MXU on v6e/v7x (128-multiples keep
    # int8 sublane packing happy); large K tiles cap VMEM independent of N and
    # amortize per-grid-step overhead.
    if tile_n is None:
        tile_n = _pick_tile(N, (256, 128, 64, 32))
    if tile_k is None:
        tile_k = _pick_tile(N, (4096, 2048, 1024, 512, 256, 128))

    grid = (N // tile_n, N // tile_k)

    # Explicit VMEM budget (2x pipeline buffering per BlockSpec input/output).
    i8, bf16, f32 = 1, 2, 4
    vmem_est = (2 * tile_n * tile_k * i8            # int8 adjacency tile
                + 2 * tile_k * F_in * bf16          # x aggregation k-tile
                + 2 * tile_n * F_in * bf16          # x root-row tile
                + 2 * tile_n * f32                  # inv_deg tile
                + 2 * 2 * F_in * F_out * bf16       # W and W_root
                + 2 * F_out * f32                   # bias
                + 2 * tile_n * F_out * f32          # output tile
                + tile_n * F_in * f32)              # accumulator scratch
    vmem_limit = int(min(64 * 1024 * 1024,
                         max(16 * 1024 * 1024, 2 * vmem_est)))

    kernel = functools.partial(_sage_layer_kernel, apply_relu=apply_relu)

    return pl.pallas_call(
        kernel,
        out_shape=jax.ShapeDtypeStruct((N, F_out), out_dtype),
        grid_spec=pltpu.PrefetchScalarGridSpec(
            num_scalar_prefetch=0,
            grid=grid,
            in_specs=[
                # adjacency tile for (node-tile i, k-tile k): (tile_n, tile_k)
                pl.BlockSpec((tile_n, tile_k), lambda i, k: (i, k)),
                # x k-tile for aggregation: (tile_k, F_in)
                pl.BlockSpec((tile_k, F_in), lambda i, k: (k, 0)),
                # x rows of this node tile (root term): (tile_n, F_in)
                pl.BlockSpec((tile_n, F_in), lambda i, k: (i, 0)),
                # reciprocal degrees of this node tile: (tile_n, 1)
                pl.BlockSpec((tile_n, 1), lambda i, k: (i, 0)),
                # weights and bias, resident across the grid
                pl.BlockSpec((F_in, F_out), lambda i, k: (0, 0)),
                pl.BlockSpec((F_in, F_out), lambda i, k: (0, 0)),
                pl.BlockSpec((1, F_out), lambda i, k: (0, 0)),
            ],
            out_specs=pl.BlockSpec((tile_n, F_out), lambda i, k: (i, 0)),
            scratch_shapes=[pltpu.VMEM((tile_n, F_in), jnp.float32)],
        ),
        compiler_params=pltpu.CompilerParams(
            dimension_semantics=("parallel", "arbitrary"),
            vmem_limit_bytes=vmem_limit),
    )(adj_i8, x, x, inv_deg, w, w_root, bias)


def glorot(key, shape):
    fan_in, fan_out = shape
    limit = jnp.sqrt(6.0 / (fan_in + fan_out))
    return jax.random.uniform(key, shape, jnp.float32, -limit, limit)


def init_sage_params(key, in_channels, hidden_channels, out_channels,
                     num_layers):
    dims = ([in_channels] + [hidden_channels] * (num_layers - 1)
            + [out_channels])
    params = []
    for l in range(num_layers):
        key, k1, k2 = jax.random.split(key, 3)
        f_in, f_out = dims[l], dims[l + 1]
        params.append({
            "weight": glorot(k1, (f_in, f_out)),
            "root_weight": glorot(k2, (f_in, f_out)),
            "bias": jnp.zeros((1, f_out), jnp.float32),
        })
    return params


def sage_forward(params, adj_i8, inv_deg, x):
    """SAGE.forward: every layer but the last is followed by ReLU."""
    # TODO(synk): F.dropout with training=True (stochastic masking) is not
    # reproduced; inference/eval semantics (identity) are used instead.
    h = x.astype(jnp.bfloat16)
    n_layers = len(params)
    for l, p in enumerate(params):
        last = l == n_layers - 1
        h = sage_layer(adj_i8, inv_deg, h,
                       p["weight"].astype(jnp.bfloat16),
                       p["root_weight"].astype(jnp.bfloat16),
                       p["bias"],
                       apply_relu=not last,
                       out_dtype=jnp.float32 if last else jnp.bfloat16)
    return h


def sage_forward_ref(params, adj_i8, inv_deg, x):
    """Pure-JAX f32 reference matching the PyTorch module."""
    a_mean = adj_i8.astype(jnp.float32) * inv_deg  # row-normalized adjacency
    n_layers = len(params)
    h = x
    for l, p in enumerate(params):
        out = (a_mean @ h) @ p["weight"] + h @ p["root_weight"] + p["bias"]
        if l < n_layers - 1:
            out = jnp.maximum(out, 0.0)
        h = out
    return h


def make_adjacency(key, n_nodes, edge_prob=0.1):
    """Dense binary adjacency (int8) + f32 reciprocal degrees; together these
    reproduce SparseTensor(...).matmul(x, reduce='mean')."""
    adj = (jax.random.uniform(key, (n_nodes, n_nodes)) < edge_prob)
    adj_i8 = adj.astype(jnp.int8)
    deg = jnp.maximum(adj.astype(jnp.float32).sum(axis=1, keepdims=True), 1.0)
    inv_deg = 1.0 / deg
    return adj_i8, inv_deg


if __name__ == "__main__":
    key = jax.random.PRNGKey(0)
    k_x, k_adj, k_params = jax.random.split(key, 3)

    # Small, module-consistent shapes.
    n_nodes = 128
    in_channels = 16
    hidden_channels = 32
    out_channels = 8
    num_layers = 3
    dropout = 0.5  # identity in eval mode

    x = jax.random.normal(k_x, (n_nodes, in_channels), jnp.float32)
    adj_i8, inv_deg = make_adjacency(k_adj, n_nodes)
    params = init_sage_params(k_params, in_channels, hidden_channels,
                              out_channels, num_layers)

    out = sage_forward(params, adj_i8, inv_deg, x)
    out = jax.block_until_ready(out)
    assert out.shape == (n_nodes, out_channels)

    # Verify against f32 reference (bf16 activations/weights -> loose tol).
    ref = sage_forward_ref(params, adj_i8, inv_deg, x)
    max_err = float(jnp.max(jnp.abs(out - ref)))
    assert max_err < 0.25, f"max abs error vs reference too large: {max_err}"

    print("KERNEL_OK")
</pallas_src>

<mosaic_0001>
module attributes {stable_mosaic.version = 11 : i64} {
  func.func @_sage_layer_kernel(%arg0: i32, %arg1: i32, %arg2: memref<128x128xi8, #tpu.memory_space<vmem>>, %arg3: memref<128x16xbf16, #tpu.memory_space<vmem>>, %arg4: memref<128x16xbf16, #tpu.memory_space<vmem>>, %arg5: memref<128x1xf32, #tpu.memory_space<vmem>>, %arg6: memref<16x32xbf16, #tpu.memory_space<vmem>>, %arg7: memref<16x32xbf16, #tpu.memory_space<vmem>>, %arg8: memref<1x32xf32, #tpu.memory_space<vmem>>, %arg9: memref<128x32xbf16, #tpu.memory_space<vmem>>, %arg10: memref<128x16xf32, #tpu.memory_space<vmem>>) attributes {dimension_semantics = [#tpu.dimension_semantics<parallel>, #tpu.dimension_semantics<arbitrary>], iteration_bounds = array<i64: 1, 1>, scalar_prefetch = 0 : i64, scratch_operands = 1 : i64, tpu.core_type = #tpu.core_type<tc>, window_params = [{transform_indices = @transform_0, window_bounds = array<i64: 128, 128>}, {transform_indices = @transform_1, window_bounds = array<i64: 128, 16>}, {transform_indices = @transform_2, window_bounds = array<i64: 128, 16>}, {transform_indices = @transform_3, window_bounds = array<i64: 128, 1>}, {pipeline_mode = #tpu.pipeline_mode<synchronous>, transform_indices = @transform_4, window_bounds = array<i64: 16, 32>}, {pipeline_mode = #tpu.pipeline_mode<synchronous>, transform_indices = @transform_5, window_bounds = array<i64: 16, 32>}, {pipeline_mode = #tpu.pipeline_mode<synchronous>, transform_indices = @transform_6, window_bounds = array<i64: 1, 32>}, {transform_indices = @transform_7, window_bounds = array<i64: 128, 32>}]} {
    %c0_i32 = arith.constant 0 : i32
    %0 = arith.cmpi eq, %arg1, %c0_i32 : i32
    %1 = arith.extui %0 : i1 to i32
    %c0_i32_0 = arith.constant 0 : i32
    %2 = arith.cmpi ne, %1, %c0_i32_0 : i32
    scf.if %2 {
      %cst_10 = arith.constant 0.000000e+00 : f32
      %13 = vector.broadcast %cst_10 : f32 to vector<128x16xf32>
      %c0_11 = arith.constant 0 : index
      %c0_12 = arith.constant 0 : index
      %14 = vector.load %arg10[%c0_11, %c0_12] : memref<128x16xf32, #tpu.memory_space<vmem>>, vector<128x16xf32>
      tpu.vector_store %arg10[%c0_11, %c0_12], %13 {strides = array<i32>} : memref<128x16xf32, #tpu.memory_space<vmem>>, vector<128x16xf32>,
    } else {
    }
    %c0 = arith.constant 0 : index
    %c0_1 = arith.constant 0 : index
    %3 = vector.load %arg2[%c0, %c0_1] : memref<128x128xi8, #tpu.memory_space<vmem>>, vector<128x128xi8>
    %4 = arith.sitofp %3 : vector<128x128xi8> to vector<128x128xbf16>
    %c0_2 = arith.constant 0 : index
    %c0_3 = arith.constant 0 : index
    %5 = vector.load %arg10[%c0_2, %c0_3] : memref<128x16xf32, #tpu.memory_space<vmem>>, vector<128x16xf32>
    %c0_4 = arith.constant 0 : index
    %c0_5 = arith.constant 0 : index
    %6 = vector.load %arg3[%c0_4, %c0_5] : memref<128x16xbf16, #tpu.memory_space<vmem>>, vector<128x16xbf16>
    %cst = arith.constant dense<0.000000e+00> : vector<128x16xf32>
    %7 = tpu.matmul %4, %6, %cst {dimension_numbers = #tpu.dot_dimension_numbers<[1], [0], [0], [1], [0, 0, 1, 1], [], []>} : vector<128x128xbf16>, vector<128x16xbf16>, vector<128x16xf32> -> vector<128x16xf32>
    %8 = arith.addf %5, %7 : vector<128x16xf32>
    %c0_6 = arith.constant 0 : index
    %c0_7 = arith.constant 0 : index
    %9 = vector.load %arg10[%c0_6, %c0_7] : memref<128x16xf32, #tpu.memory_space<vmem>>, vector<128x16xf32>
    tpu.vector_store %arg10[%c0_6, %c0_7], %8 {strides = array<i32>} : memref<128x16xf32, #tpu.memory_space<vmem>>, vector<128x16xf32>,
    %c0_i32_8 = arith.constant 0 : i32
    %10 = arith.cmpi eq, %arg1, %c0_i32_8 : i32
    %11 = arith.extui %10 : i1 to i32
    %c0_i32_9 = arith.constant 0 : i32
    %12 = arith.cmpi ne, %11, %c0_i32_9 : i32
    scf.if %12 {
      %c0_10 = arith.constant 0 : index
      %c0_11 = arith.constant 0 : index
      %13 = vector.load %arg10[%c0_10, %c0_11] : memref<128x16xf32, #tpu.memory_space<vmem>>, vector<128x16xf32>
      %c0_12 = arith.constant 0 : index
      %c0_13 = arith.constant 0 : index
      %14 = vector.load %arg5[%c0_12, %c0_13] : memref<128x1xf32, #tpu.memory_space<vmem>>, vector<128x1xf32>
      %15 = vector.broadcast %14 : vector<128x1xf32> to vector<128x16xf32>
      %16 = arith.mulf %13, %15 : vector<128x16xf32>
      %17 = arith.truncf %16 : vector<128x16xf32> to vector<128x16xbf16>
      %c0_14 = arith.constant 0 : index
      %c0_15 = arith.constant 0 : index
      %18 = vector.load %arg6[%c0_14, %c0_15] : memref<16x32xbf16, #tpu.memory_space<vmem>>, vector<16x32xbf16>
      %cst_16 = arith.constant dense<0.000000e+00> : vector<128x32xf32>
      %19 = tpu.matmul %17, %18, %cst_16 {dimension_numbers = #tpu.dot_dimension_numbers<[1], [0], [0], [1], [0, 0, 1, 1], [], []>} : vector<128x16xbf16>, vector<16x32xbf16>, vector<128x32xf32> -> vector<128x32xf32>
      %c0_17 = arith.constant 0 : index
      %c0_18 = arith.constant 0 : index
      %20 = vector.load %arg4[%c0_17, %c0_18] : memref<128x16xbf16, #tpu.memory_space<vmem>>, vector<128x16xbf16>
      %c0_19 = arith.constant 0 : index
      %c0_20 = arith.constant 0 : index
      %21 = vector.load %arg7[%c0_19, %c0_20] : memref<16x32xbf16, #tpu.memory_space<vmem>>, vector<16x32xbf16>
      %cst_21 = arith.constant dense<0.000000e+00> : vector<128x32xf32>
      %22 = tpu.matmul %20, %21, %cst_21 {dimension_numbers = #tpu.dot_dimension_numbers<[1], [0], [0], [1], [0, 0, 1, 1], [], []>} : vector<128x16xbf16>, vector<16x32xbf16>, vector<128x32xf32> -> vector<128x32xf32>
      %23 = arith.addf %19, %22 : vector<128x32xf32>
      %c0_22 = arith.constant 0 : index
      %c0_23 = arith.constant 0 : index
      %24 = vector.load %arg8[%c0_22, %c0_23] : memref<1x32xf32, #tpu.memory_space<vmem>>, vector<1x32xf32>
      %25 = vector.broadcast %24 : vector<1x32xf32> to vector<128x32xf32>
      %26 = arith.addf %23, %25 : vector<128x32xf32>
      %cst_24 = arith.constant 0.000000e+00 : f32
      %27 = vector.broadcast %cst_24 : f32 to vector<128x32xf32>
      %28 = arith.maximumf %26, %27 : vector<128x32xf32>
      %29 = arith.truncf %28 : vector<128x32xf32> to vector<128x32xbf16>
      %c0_25 = arith.constant 0 : index
      %c0_26 = arith.constant 0 : index
      %30 = vector.load %arg9[%c0_25, %c0_26] : memref<128x32xbf16, #tpu.memory_space<vmem>>, vector<128x32xbf16>
      tpu.vector_store %arg9[%c0_25, %c0_26], %29 {strides = array<i32>} : memref<128x32xbf16, #tpu.memory_space<vmem>>, vector<128x32xbf16>,
    } else {
    }
    return
  }
  func.func @transform_0(%arg0: i32, %arg1: i32) -> (i32, i32) {
    %c0_i32 = arith.constant 0 : i32
    return %arg0, %arg1 : i32, i32
  }
  func.func @transform_1(%arg0: i32, %arg1: i32) -> (i32, i32) {
    %c0_i32 = arith.constant 0 : i32
    %c0_i32_0 = arith.constant 0 : i32
    return %arg1, %c0_i32 : i32, i32
  }
  func.func @transform_2(%arg0: i32, %arg1: i32) -> (i32, i32) {
    %c0_i32 = arith.constant 0 : i32
    %c0_i32_0 = arith.constant 0 : i32
    return %arg0, %c0_i32 : i32, i32
  }
  func.func @transform_3(%arg0: i32, %arg1: i32) -> (i32, i32) {
    %c0_i32 = arith.constant 0 : i32
    %c0_i32_0 = arith.constant 0 : i32
    return %arg0, %c0_i32 : i32, i32
  }
  func.func @transform_4(%arg0: i32, %arg1: i32) -> (i32, i32) {
    %c0_i32 = arith.constant 0 : i32
    %c0_i32_0 = arith.constant 0 : i32
    %c0_i32_1 = arith.constant 0 : i32
    return %c0_i32, %c0_i32_0 : i32, i32
  }
  func.func @transform_5(%arg0: i32, %arg1: i32) -> (i32, i32) {
    %c0_i32 = arith.constant 0 : i32
    %c0_i32_0 = arith.constant 0 : i32
    %c0_i32_1 = arith.constant 0 : i32
    return %c0_i32, %c0_i32_0 : i32, i32
  }
  func.func @transform_6(%arg0: i32, %arg1: i32) -> (i32, i32) {
    %c0_i32 = arith.constant 0 : i32
    %c0_i32_0 = arith.constant 0 : i32
    %c0_i32_1 = arith.constant 0 : i32
    return %c0_i32, %c0_i32_0 : i32, i32
  }
  func.func @transform_7(%arg0: i32, %arg1: i32) -> (i32, i32) {
    %c0_i32 = arith.constant 0 : i32
    %c0_i32_0 = arith.constant 0 : i32
    return %arg0, %c0_i32 : i32, i32
  }
}

</mosaic_0001>

<bundles_post_ra>
// kernel: tpu_custom_call.1
= control target key start
LH: loop header
LB: loop body
LE: loop exit
PB: predicated region body
PF: predicated region fallthrough
CT: control target
= control target key end

     0   :  { %v1054_v1 = vmov 0   ;;  %vm31_vm0 = vcmask 130048   ;;  %v1055_v26 = vmov 0.0   ;;  %vm826_vm1 = vcmask 257024   ;;  %s1347_s1 = inlined_call_operand.vmem [shape: bf16[128,16], index: 1, kind: input, shape index: {}]   ;;  %s1348_s0 = inlined_call_operand.vmem [shape: s8[128,128], index: 0, kind: input, shape index: {}]   ;;  %s1349_s3 = inlined_call_operand.vmem [shape: f32[128,1], index: 3, kind: input, shape index: {}]   ;;  %s1350_s5 = inlined_call_operand.vmem [shape: bf16[16,32], index: 5, kind: input, shape index: {}]   ;;  %s1351_s4 = inlined_call_operand.vmem [shape: bf16[16,32], index: 4, kind: input, shape index: {}]   ;;  %s1352_s2 = inlined_call_operand.vmem [shape: bf16[128,16], index: 2, kind: input, shape index: {}]   ;;  %s1353_s6 = inlined_call_operand.vmem [shape: f32[1,32], index: 6, kind: input, shape index: {}]   ;;  %s1354_s7 = inlined_call_operand.vmem [shape: bf16[128,32], index: 7, kind: output, shape index: {}]  }
   0x1   :  { %v1036_v0 = vld [vmem:[%s1347_s1] sm:$0xff]   ;;  %1034 = vset.pattern.permute.xlu0 %v1054_v1  ;;  %1035 = vset.pattern.permute.xlu1 %v1054_v1  ;;  %v1037_v2 = vld [vmem:[%s1347_s1 + $0x8] sm:$0xff]   ;;  %v1038_v3 = vld [vmem:[%s1347_s1 + $0x10] sm:$0xff]   ;;  %34 = vst.msk [vmem:[#allocation2 + $0x10] sm:$0xff] %vm31_vm0, %v1055_v26 }
   0x2   :  { %948 = vmatprep.subr.bf16.mxu0 %v1036_v0  ;;  %v1039_v4 = vld [vmem:[%s1347_s1 + $0x18] sm:$0xff]   ;;  %v1111_v5 = vld [vmem:[%s1348_s0] sm:$0xff]  ;;  %v291_v8 = vld [vmem:[%s1349_s3 + $0x10] sm:$0xff]  ;;  %32 = vst.msk [vmem:[#allocation2] sm:$0xff] %vm31_vm0, %v1055_v26 }
   0x3   :  { %949 = vmatpush3.bf16.msra.mxu0 %v1036_v0  ;;  %v52_v6 = vunpack.c.l.s8.bf16 %v1111_v5  ;;  %v289_v7 = vld [vmem:[%s1349_s3] sm:$0xff]  ;;  %317 = vperm.xlu1 %1035, %v291_v8   ;;  %v290_v9 = vld [vmem:[%s1349_s3 + $0x8] sm:$0xff]  ;;  %v292_v10 = vld [vmem:[%s1349_s3 + $0x18] sm:$0xff]  ;;  %33 = vst.msk [vmem:[#allocation2 + $0x8] sm:$0xff] %vm31_vm0, %v1055_v26  ;;  %v53_v31 = vunpack.c.h.s8.bf16 %v1111_v5 }
   0x4   :  { %950 = vmatprep.subr.bf16.mxu0 %v1037_v2  ;;  %307 = vperm.xlu0 %1034, %v289_v7   ;;  %v1040_v11 = vld [vmem:[%s1347_s1 + $0x20] sm:$0xff]   ;;  %v1041_v12 = vld [vmem:[%s1347_s1 + $0x28] sm:$0xff]   ;;  %v295_v17 = vld [vmem:[%s1349_s3 + $0x30] sm:$0xff]  ;;  %35 = vst.msk [vmem:[#allocation2 + $0x18] sm:$0xff] %vm31_vm0, %v1055_v26 }
   0x5   :  { %964 = vmatprep.mubr.bf16.mxu0 %v52_v6  ;;  %v293_v13 = vld [vmem:[%s1349_s3 + $0x20] sm:$0xff]  ;;  %v294_v14 = vld [vmem:[%s1349_s3 + $0x28] sm:$0xff]  ;;  %v296_v18 = vld [vmem:[%s1349_s3 + $0x38] sm:$0xff]  ;;  %36 = vst.msk [vmem:[#allocation2 + $0x20] sm:$0xff] %vm31_vm0, %v1055_v26 }
   0x6   :  { %v1044_v15 = vld [vmem:[%s1350_s5] sm:$0xff]   ;;  %v1042_v20 = vld [vmem:[%s1347_s1 + $0x30] sm:$0xff]   ;;  %v1047_v21 = vld [vmem:[%s1352_s2 + $0x8] sm:$0xff]   ;;  %37 = vst.msk [vmem:[#allocation2 + $0x28] sm:$0xff] %vm31_vm0, %v1055_v26 }
   0x7   :  { %951 = vmatpush3.bf16.msra.mxu0 %v1037_v2  ;;  %322 = vperm.xlu1 %1035, %v292_v10   ;;  %v1045_v16 = vld [vmem:[%s1351_s4] sm:$0xff]   ;;  %v1048_v22 = vld [vmem:[%s1352_s2 + $0x10] sm:$0xff]   ;;  %v298_v24 = vld [vmem:[%s1349_s3 + $0x48] sm:$0xff]  ;;  %38 = vst.msk [vmem:[#allocation2 + $0x30] sm:$0xff] %vm31_vm0, %v1055_v26 }
   0x8   :  { %952 = vmatprep.subr.bf16.mxu0 %v1038_v3  ;;  %312 = vperm.xlu0 %1034, %v290_v9   ;;  %v1046_v19 = vld [vmem:[%s1352_s2] sm:$0xff]   ;;  %v1043_v25 = vld [vmem:[%s1347_s1 + $0x38] sm:$0xff]   ;;  %39 = vst.msk [vmem:[#allocation2 + $0x38] sm:$0xff] %vm31_vm0, %v1055_v26  ;;  %40 = vst.msk [vmem:[#allocation2 + $0x40] sm:$0xff] %vm31_vm0, %v1055_v26 }
   0x9   :  { %980 = vmatprep.subr.bf16.mxu1 %v1044_v15  ;;  %982 = vmatprep.mubr.msk.bf16.mxu1 %vm31_vm0, %v1046_v19  ;;  %v297_v23 = vld [vmem:[%s1349_s3 + $0x40] sm:$0xff]  ;;  %41 = vst.msk [vmem:[#allocation2 + $0x48] sm:$0xff] %vm31_vm0, %v1055_v26  ;;  %42 = vst.msk [vmem:[#allocation2 + $0x50] sm:$0xff] %vm31_vm0, %v1055_v26  ;;  %v299_v27 = vld [vmem:[%s1349_s3 + $0x50] sm:$0xff] }
   0xa   :  { %981 = vmatpush3.bf16.msra.mxu1 %v1044_v15  ;;  %43 = vst.msk [vmem:[#allocation2 + $0x58] sm:$0xff] %vm31_vm0, %v1055_v26  ;;  %44 = vst.msk [vmem:[#allocation2 + $0x60] sm:$0xff] %vm31_vm0, %v1055_v26  ;;  %v300_v28 = vld [vmem:[%s1349_s3 + $0x58] sm:$0xff]  ;;  %v49_v30 = vld [vmem:[%s1348_s0 + $0x8] sm:$0xff] }
   0xb   :  { %953 = vmatpush3.bf16.msra.mxu0 %v1038_v3  ;;  %332 = vperm.xlu1 %1035, %v294_v14   ;;  %45 = vst.msk [vmem:[#allocation2 + $0x68] sm:$0xff] %vm31_vm0, %v1055_v26  ;;  %46 = vst.msk [vmem:[#allocation2 + $0x70] sm:$0xff] %vm31_vm0, %v1055_v26  ;;  %v1049_v29 = vld [vmem:[%s1352_s2 + $0x18] sm:$0xff]   ;;  %v54_v32 = vunpack.c.l.s8.bf16 %v49_v30  ;;  %v301_v33 = vld [vmem:[%s1349_s3 + $0x60] sm:$0xff]  ;;  %v55_v38 = vunpack.c.h.s8.bf16 %v49_v30 }
   0xc   :  { %954 = vmatprep.subr.bf16.mxu0 %v1039_v4  ;;  %327 = vperm.xlu0 %1034, %v293_v13   ;;  %47 = vst.msk [vmem:[#allocation2 + $0x78] sm:$0xff] %vm31_vm0, %v1055_v26  ;;  %v302_v34 = vld [vmem:[%s1349_s3 + $0x68] sm:$0xff]  ;;  %v303_v35 = vld [vmem:[%s1349_s3 + $0x70] sm:$0xff]  ;;  %v304_v37 = vld [vmem:[%s1349_s3 + $0x78] sm:$0xff] }
   0xd   :  { %998 = vmatprep.subr.bf16.mxu1 %v1045_v16  ;;  %983 = vmatmul.mubr.msk.bf16.vlgmr.msra.gmra.mrb[0].mxu1 %vm31_vm0, %v1047_v21  ;;  %v50_v36 = vld [vmem:[%s1348_s0 + $0x10] sm:$0xff]  ;;  %v51_v40 = vld [vmem:[%s1348_s0 + $0x18] sm:$0xff]  ;;  %v1050_v44 = vld [vmem:[%s1352_s2 + $0x20] sm:$0xff]  }
   0xe   :  { %999 = vmatpush3.bf16.msra.mxu1 %v1045_v16  ;;  %986 = vmatprep.mubr.msk.bf16.mxu1 %vm31_vm0, %v1048_v22  ;;  %v56_v39 = vunpack.c.l.s8.bf16 %v50_v36  ;;  %v57_v41 = vunpack.c.h.s8.bf16 %v50_v36  ;;  %v58_v42 = vunpack.c.l.s8.bf16 %v51_v40  ;;  %v59_v43 = vunpack.c.h.s8.bf16 %v51_v40  ;;  %v1051_v45 = vld [vmem:[%s1352_s2 + $0x28] sm:$0xff]   ;;  %v1052_v46 = vld [vmem:[%s1352_s2 + $0x30] sm:$0xff]   ;;  %v1053_v47 = vld [vmem:[%s1352_s2 + $0x38] sm:$0xff]  }
   0xf   :  { %955 = vmatpush3.bf16.msra.mxu0 %v1039_v4  ;;  %342 = vperm.xlu1 %1035, %v296_v18   ;;  %v62_v50 = vld [vmem:[#allocation2 + $0x10] sm:$0xff]  ;;  %v60_v51 = vld [vmem:[#allocation2] sm:$0xff]  ;;  %v63_v54 = vld [vmem:[#allocation2 + $0x18] sm:$0xff] }
  0x10   :  { %956 = vmatprep.subr.bf16.mxu0 %v1040_v11  ;;  %337 = vperm.xlu0 %1034, %v295_v17   ;;  %v61_v57 = vld [vmem:[#allocation2 + $0x8] sm:$0xff]  ;;  %v66_v1 = vld [vmem:[#allocation2 + $0x30] sm:$0xff]  ;;  %v64_v2 = vld [vmem:[#allocation2 + $0x20] sm:$0xff] }
  0x11   :  { %v67_v5 = vld [vmem:[#allocation2 + $0x38] sm:$0xff]  ;;  %v65_v8 = vld [vmem:[#allocation2 + $0x28] sm:$0xff]  ;;  %v70_v21 = vld [vmem:[#allocation2 + $0x50] sm:$0xff] }
  0x13   :  { %957 = vmatpush3.bf16.msra.mxu0 %v1040_v11  ;;  %352 = vperm.xlu1 %1035, %v298_v24   ;;  %v68_v24 = vld [vmem:[#allocation2 + $0x40] sm:$0xff] }
  0x14   :  { %958 = vmatprep.subr.bf16.mxu0 %v1041_v12  ;;  %347 = vperm.xlu0 %1034, %v297_v23  }
  0x15   :  { %987 = vmatmul.mubr.msk.bf16.gmra.mrb[4].mxu1 %vm31_vm0, %v1049_v29 }
  0x16   :  { %990 = vmatprep.mubr.msk.bf16.mxu1 %vm31_vm0, %v1050_v44 }
  0x17   :  { %959 = vmatpush3.bf16.msra.mxu0 %v1041_v12  ;;  %362 = vperm.xlu1 %1035, %v300_v28  }
  0x18   :  { %960 = vmatprep.subr.bf16.mxu0 %v1042_v20  ;;  %357 = vperm.xlu0 %1034, %v299_v27   ;;  %v71_v27 = vld [vmem:[#allocation2 + $0x58] sm:$0xff] }
  0x1b   :  { %961 = vmatpush3.bf16.msra.mxu0 %v1042_v20  ;;  %372 = vperm.xlu1 %1035, %v302_v34  }
  0x1c   :  { %962 = vmatprep.subr.bf16.mxu0 %v1043_v25  ;;  %367 = vperm.xlu0 %1034, %v301_v33  }
  0x1d   :  { %991 = vmatmul.mubr.msk.bf16.gmra.mrb[8].mxu1 %vm31_vm0, %v1051_v45  ;;  %v74_v45 = vld [vmem:[#allocation2 + $0x70] sm:$0xff] }
  0x1e   :  { %994 = vmatprep.mubr.msk.bf16.mxu1 %vm31_vm0, %v1052_v46 }
  0x1f   :  { %963 = vmatpush3.bf16.msra.mxu0 %v1043_v25  ;;  %382 = vperm.xlu1 %1035, %v304_v37  }
  0x20   :  { %377 = vperm.xlu0 %1034, %v303_v35  }
  0x22   :  { %965 = vmatmul.mubr.bf16.vlgmr.msra.gmra.mrb[0].mxu0 %v53_v31  ;;  %v69_v31 = vld [vmem:[#allocation2 + $0x48] sm:$0xff] }
  0x23   :  { %968 = vmatprep.mubr.bf16.mxu0 %v54_v32 }
  0x25   :  { %995 = vmatmul.mubr.msk.bf16.gmra.mrb[12].mxu1 %vm31_vm0, %v1053_v47 }
  0x2a   :  { %969 = vmatmul.mubr.bf16.gmra.mrb[4].mxu0 %v55_v38 }
  0x2b   :  { %972 = vmatprep.mubr.bf16.mxu0 %v56_v39 }
  0x32   :  { %973 = vmatmul.mubr.bf16.gmra.mrb[8].mxu0 %v57_v41 }
  0x33   :  { %976 = vmatprep.mubr.bf16.mxu0 %v58_v42 }
  0x3a   :  { %977 = vmatmul.mubr.bf16.gmra.mrb[12].mxu0 %v59_v43 }
  0x82   :  { %v318_v48 = vpop.permute.xlu1 %317 }
  0x83   :  { %v308_v49 = vpop.permute.xlu0 %307 }
  0x86   :  { %v323_v52 = vpop.permute.xlu1 %322 }
  0x87   :  { %v313_v58 = vpop.permute.xlu0 %312 }
  0x8a   :  { %v333_v0 = vpop.permute.xlu1 %332 }
  0x8b   :  { %v328_v3 = vpop.permute.xlu0 %327 }
  0x8e   :  { %v343_v14 = vpop.permute.xlu1 %342 }
  0x8f   :  { %v338_v20 = vpop.permute.xlu0 %337 }
  0x92   :  { %v353_v33 = vpop.permute.xlu1 %352 }
  0x93   :  { %v348_v39 = vpop.permute.xlu0 %347 }
  0xf5   :  { %v966_v53 = vpop.f32.mrb[0].mxu0 }
  0xf6   :  { %v239_v55 = vadd.f32 %v966_v53, %v62_v50  ;;  %v174_v56 = vpop.f32.mrb[1].mxu0  ;;  %v363_v50 = vpop.permute.xlu1 %362 }
  0xf7   :  { %v237_v59 = vadd.f32 %v174_v56, %v60_v51  ;;  %v967_v60 = vpop.f32.mrb[2].mxu0  ;;  %v73_v56 = vld [vmem:[#allocation2 + $0x68] sm:$0xff] }
  0xf8   :  { %256 = vst.msk [vmem:[#allocation2 + $0x10] sm:$0xff] %vm31_vm0, %v239_v55  ;;  %v240_v61 = vadd.f32 %v967_v60, %v63_v54  ;;  %v177_v62 = vpop.f32.mrb[3].mxu0 }
  0xf9   :  { %254 = vst.msk [vmem:[#allocation2] sm:$0xff] %vm31_vm0, %v237_v59  ;;  %v238_v63 = vadd.f32 %v177_v62, %v61_v57 }
  0xfa   :  { %257 = vst.msk [vmem:[#allocation2 + $0x18] sm:$0xff] %vm31_vm0, %v240_v61 }
  0xfb   :  { %255 = vst.msk [vmem:[#allocation2 + $0x8] sm:$0xff] %vm31_vm0, %v238_v63 }
  0xfd   :  { %v970_v4 = vpop.f32.mrb[4].mxu0 }
  0xfe   :  { %v243_v6 = vadd.f32 %v970_v4, %v66_v1  ;;  %v190_v7 = vpop.f32.mrb[5].mxu0 }
  0xff   :  { %v241_v9 = vadd.f32 %v190_v7, %v64_v2  ;;  %v971_v10 = vpop.f32.mrb[6].mxu0  ;;  %v275_v16 = vld [vmem:[#allocation2 + $0x10] sm:$0xff] }
 0x100   :  { %260 = vst.msk [vmem:[#allocation2 + $0x30] sm:$0xff] %vm31_vm0, %v243_v6  ;;  %v244_v11 = vadd.f32 %v971_v10, %v67_v5  ;;  %v193_v12 = vpop.f32.mrb[7].mxu0  ;;  %v273_v13 = vld [vmem:[#allocation2] sm:$0xff]  ;;  %v387_v25 = vmul.f32 %v318_v48, %v275_v16  ;;  %v373_v5 = vpop.permute.xlu1 %372 }
 0x101   :  { %258 = vst.msk [vmem:[#allocation2 + $0x20] sm:$0xff] %vm31_vm0, %v241_v9  ;;  %v242_v15 = vadd.f32 %v193_v12, %v65_v8  ;;  %v276_v17 = vld [vmem:[#allocation2 + $0x18] sm:$0xff]  ;;  %v385_v22 = vmul.f32 %v308_v49, %v273_v13  ;;  %v72_v48 = vld [vmem:[#allocation2 + $0x60] sm:$0xff] }
 0x102   :  { %261 = vst.msk [vmem:[#allocation2 + $0x38] sm:$0xff] %vm31_vm0, %v244_v11  ;;  %v274_v18 = vld [vmem:[#allocation2 + $0x8] sm:$0xff]  ;;  %v388_v19 = vmul.f32 %v323_v52, %v276_v17  ;;  %v75_v52 = vld [vmem:[#allocation2 + $0x78] sm:$0xff] }
 0x103   :  { %259 = vst.msk [vmem:[#allocation2 + $0x28] sm:$0xff] %vm31_vm0, %v242_v15  ;;  %v386_v23 = vmul.f32 %v313_v58, %v274_v18  ;;  %v358_v58 = vpop.permute.xlu0 %357 }
 0x104   :  { %v402_v32 = vpack.c.bf16 %v388_v19, %v387_v25  ;;  %v383_v13 = vpop.permute.xlu1 %382 }
 0x105   :  { %v974_v26 = vpop.f32.mrb[8].mxu0  ;;  %v401_v28 = vpack.c.bf16 %v386_v23, %v385_v22 }
 0x106   :  { %v247_v29 = vadd.f32 %v974_v26, %v70_v21  ;;  %v206_v30 = vpop.f32.mrb[9].mxu0 }
 0x107   :  { %v245_v34 = vadd.f32 %v206_v30, %v68_v24  ;;  %v975_v35 = vpop.f32.mrb[10].mxu0  ;;  %1000 = vmatprep.mubr.msk.bf16.mxu1 %vm31_vm0, %v401_v28  ;;  %v279_v41 = vld [vmem:[#allocation2 + $0x30] sm:$0xff]  ;;  %v368_v9 = vpop.permute.xlu0 %367  ;;  %v1265_v24 = vld [vmem:[%s1353_s6] ss:$0 sm:$0xff] }
 0x108   :  { %264 = vst.msk [vmem:[#allocation2 + $0x50] sm:$0xff] %vm31_vm0, %v247_v29  ;;  %v248_v36 = vadd.f32 %v975_v35, %v71_v27  ;;  %v209_v37 = vpop.f32.mrb[11].mxu0  ;;  %1001 = vmatmul.mubr.msk.bf16.vlgmr.msra.gmra.mrb[0].mxu1 %vm31_vm0, %v402_v32  ;;  %v277_v38 = vld [vmem:[#allocation2 + $0x20] sm:$0xff]  ;;  %v391_v49 = vmul.f32 %v338_v20, %v279_v41 }
 0x109   :  { %262 = vst.msk [vmem:[#allocation2 + $0x40] sm:$0xff] %vm31_vm0, %v245_v34  ;;  %v246_v40 = vadd.f32 %v209_v37, %v69_v31  ;;  %v280_v42 = vld [vmem:[#allocation2 + $0x38] sm:$0xff]  ;;  %v389_v46 = vmul.f32 %v328_v3, %v277_v38 }
 0x10a   :  { %265 = vst.msk [vmem:[#allocation2 + $0x58] sm:$0xff] %vm31_vm0, %v248_v36  ;;  %v278_v43 = vld [vmem:[#allocation2 + $0x28] sm:$0xff]  ;;  %v392_v44 = vmul.f32 %v343_v14, %v280_v42 }
 0x10b   :  { %263 = vst.msk [vmem:[#allocation2 + $0x48] sm:$0xff] %vm31_vm0, %v246_v40  ;;  %v390_v47 = vmul.f32 %v333_v0, %v278_v43  ;;  %v378_v18 = vpop.permute.xlu0 %377 }
 0x10c   :  { %v404_v57 = vpack.c.bf16 %v392_v44, %v391_v49 }
 0x10d   :  { %v978_v51 = vpop.f32.mrb[12].mxu0  ;;  %v403_v53 = vpack.c.bf16 %v390_v47, %v389_v46 }
 0x10e   :  { %v251_v54 = vadd.f32 %v978_v51, %v74_v45  ;;  %v222_v55 = vpop.f32.mrb[13].mxu0 }
 0x10f   :  { %v249_v59 = vadd.f32 %v222_v55, %v72_v48  ;;  %v979_v60 = vpop.f32.mrb[14].mxu0  ;;  %1004 = vmatprep.mubr.msk.bf16.mxu1 %vm31_vm0, %v403_v53  ;;  %v283_v1 = vld [vmem:[#allocation2 + $0x50] sm:$0xff] }
 0x110   :  { %268 = vst.msk [vmem:[#allocation2 + $0x70] sm:$0xff] %vm31_vm0, %v251_v54  ;;  %v252_v61 = vadd.f32 %v979_v60, %v75_v52  ;;  %v225_v62 = vpop.f32.mrb[15].mxu0  ;;  %1005 = vmatmul.mubr.msk.bf16.gmra.mrb[4].mxu1 %vm31_vm0, %v404_v57  ;;  %v281_v63 = vld [vmem:[#allocation2 + $0x40] sm:$0xff]  ;;  %v395_v8 = vmul.f32 %v358_v58, %v283_v1 }
 0x111   :  { %266 = vst.msk [vmem:[#allocation2 + $0x60] sm:$0xff] %vm31_vm0, %v249_v59  ;;  %v250_v0 = vadd.f32 %v225_v62, %v73_v56  ;;  %v284_v2 = vld [vmem:[#allocation2 + $0x58] sm:$0xff]  ;;  %v393_v6 = vmul.f32 %v348_v39, %v281_v63 }
 0x112   :  { %269 = vst.msk [vmem:[#allocation2 + $0x78] sm:$0xff] %vm31_vm0, %v252_v61  ;;  %v282_v3 = vld [vmem:[#allocation2 + $0x48] sm:$0xff]  ;;  %v396_v4 = vmul.f32 %v363_v50, %v284_v2 }
 0x113   :  { %267 = vst.msk [vmem:[#allocation2 + $0x68] sm:$0xff] %vm31_vm0, %v250_v0  ;;  %v394_v7 = vmul.f32 %v353_v33, %v282_v3 }
 0x114   :  { %v406_v11 = vpack.c.bf16 %v396_v4, %v395_v8 }
 0x115   :  { %v405_v10 = vpack.c.bf16 %v394_v7, %v393_v6 }
 0x117   :  { %1008 = vmatprep.mubr.msk.bf16.mxu1 %vm31_vm0, %v405_v10  ;;  %v287_v14 = vld [vmem:[#allocation2 + $0x70] sm:$0xff] }
 0x118   :  { %1009 = vmatmul.mubr.msk.bf16.gmra.mrb[8].mxu1 %vm31_vm0, %v406_v11  ;;  %v285_v12 = vld [vmem:[#allocation2 + $0x60] sm:$0xff]  ;;  %v399_v21 = vmul.f32 %v378_v18, %v287_v14 }
 0x119   :  { %v288_v15 = vld [vmem:[#allocation2 + $0x78] sm:$0xff]  ;;  %v397_v19 = vmul.f32 %v368_v9, %v285_v12 }
 0x11a   :  { %v286_v16 = vld [vmem:[#allocation2 + $0x68] sm:$0xff]  ;;  %v400_v17 = vmul.f32 %v383_v13, %v288_v15 }
 0x11b   :  { %v398_v20 = vmul.f32 %v373_v5, %v286_v16 }
 0x11c   :  { %v408_v23 = vpack.c.bf16 %v400_v17, %v399_v21 }
 0x11d   :  { %v407_v22 = vpack.c.bf16 %v398_v20, %v397_v19 }
 0x11f   :  { %1012 = vmatprep.mubr.msk.bf16.mxu1 %vm31_vm0, %v407_v22 }
 0x120   :  { %1013 = vmatmul.mubr.msk.bf16.gmra.mrb[12].mxu1 %vm31_vm0, %v408_v23 }
 0x1db   :  { %v1002_v25 = vpop.f32.mrb[0].mxu1 }
 0x1dc   :  { %v732_v26 = vadd.f32 %v1002_v25, %v1265_v24  ;;  %v660_v27 = vpop.f32.mrb[1].mxu1 }
 0x1dd   :  { %v730_v28 = vadd.f32 %v1265_v24, %v660_v27  ;;  %v1003_v29 = vpop.f32.mrb[2].mxu1 }
 0x1de   :  { %v748_v30 = vmax.f32 %v732_v26, 0.0  ;;  %v733_v31 = vadd.f32 %v1003_v29, %v1265_v24  ;;  %v663_v32 = vpop.f32.mrb[3].mxu1 }
 0x1df   :  { %v746_v33 = vmax.f32 %v730_v28, 0.0  ;;  %v731_v34 = vadd.f32 %v1265_v24, %v663_v32 }
 0x1e0   :  { %v900_v35 = vpack.c.bf16 %v748_v30, %v748_v30  ;;  %v749_v36 = vmax.f32 %v733_v31, 0.0 }
 0x1e1   :  { %v898_v37 = vpack.c.bf16 %v746_v33, %v746_v33  ;;  %v747_v38 = vmax.f32 %v731_v34, 0.0 }
 0x1e2   :  { %829 = vst.msk [vmem:[%s1354_s7 + $0x8] sm:$0xf] %vm826_vm1, %v900_v35  ;;  %v901_v39 = vpack.c.bf16 %v749_v36, %v749_v36 }
 0x1e3   :  { %827 = vst.msk [vmem:[%s1354_s7] sm:$0xf] %vm826_vm1, %v898_v37  ;;  %v899_v40 = vpack.c.bf16 %v747_v38, %v747_v38  ;;  %v1006_v41 = vpop.f32.mrb[4].mxu1 }
 0x1e4   :  { %830 = vst.msk [vmem:[%s1354_s7 + $0xc] sm:$0xf] %vm826_vm1, %v901_v39  ;;  %v736_v42 = vadd.f32 %v1006_v41, %v1265_v24  ;;  %v676_v43 = vpop.f32.mrb[5].mxu1 }
 0x1e5   :  { %828 = vst.msk [vmem:[%s1354_s7 + $0x4] sm:$0xf] %vm826_vm1, %v899_v40  ;;  %v734_v44 = vadd.f32 %v1265_v24, %v676_v43  ;;  %v1007_v45 = vpop.f32.mrb[6].mxu1 }
 0x1e6   :  { %v752_v46 = vmax.f32 %v736_v42, 0.0  ;;  %v737_v47 = vadd.f32 %v1007_v45, %v1265_v24  ;;  %v679_v48 = vpop.f32.mrb[7].mxu1 }
 0x1e7   :  { %v750_v49 = vmax.f32 %v734_v44, 0.0  ;;  %v735_v50 = vadd.f32 %v1265_v24, %v679_v48 }
 0x1e8   :  { %v904_v51 = vpack.c.bf16 %v752_v46, %v752_v46  ;;  %v753_v52 = vmax.f32 %v737_v47, 0.0 }
 0x1e9   :  { %v902_v53 = vpack.c.bf16 %v750_v49, %v750_v49  ;;  %v751_v54 = vmax.f32 %v735_v50, 0.0 }
 0x1ea   :  { %833 = vst.msk [vmem:[%s1354_s7 + $0x18] sm:$0xf] %vm826_vm1, %v904_v51  ;;  %v905_v55 = vpack.c.bf16 %v753_v52, %v753_v52 }
 0x1eb   :  { %831 = vst.msk [vmem:[%s1354_s7 + $0x10] sm:$0xf] %vm826_vm1, %v902_v53  ;;  %v903_v56 = vpack.c.bf16 %v751_v54, %v751_v54  ;;  %v1010_v57 = vpop.f32.mrb[8].mxu1 }
 0x1ec   :  { %834 = vst.msk [vmem:[%s1354_s7 + $0x1c] sm:$0xf] %vm826_vm1, %v905_v55  ;;  %v740_v58 = vadd.f32 %v1010_v57, %v1265_v24  ;;  %v692_v59 = vpop.f32.mrb[9].mxu1 }
 0x1ed   :  { %832 = vst.msk [vmem:[%s1354_s7 + $0x14] sm:$0xf] %vm826_vm1, %v903_v56  ;;  %v738_v60 = vadd.f32 %v1265_v24, %v692_v59  ;;  %v1011_v61 = vpop.f32.mrb[10].mxu1 }
 0x1ee   :  { %v756_v62 = vmax.f32 %v740_v58, 0.0  ;;  %v741_v63 = vadd.f32 %v1011_v61, %v1265_v24  ;;  %v695_v0 = vpop.f32.mrb[11].mxu1 }
 0x1ef   :  { %v754_v1 = vmax.f32 %v738_v60, 0.0  ;;  %v739_v2 = vadd.f32 %v1265_v24, %v695_v0 }
 0x1f0   :  { %v908_v3 = vpack.c.bf16 %v756_v62, %v756_v62  ;;  %v757_v4 = vmax.f32 %v741_v63, 0.0 }
 0x1f1   :  { %v906_v5 = vpack.c.bf16 %v754_v1, %v754_v1  ;;  %v755_v6 = vmax.f32 %v739_v2, 0.0 }
 0x1f2   :  { %837 = vst.msk [vmem:[%s1354_s7 + $0x28] sm:$0xf] %vm826_vm1, %v908_v3  ;;  %v909_v7 = vpack.c.bf16 %v757_v4, %v757_v4 }
 0x1f3   :  { %835 = vst.msk [vmem:[%s1354_s7 + $0x20] sm:$0xf] %vm826_vm1, %v906_v5  ;;  %v907_v8 = vpack.c.bf16 %v755_v6, %v755_v6  ;;  %v1014_v9 = vpop.f32.mrb[12].mxu1 }
 0x1f4   :  { %838 = vst.msk [vmem:[%s1354_s7 + $0x2c] sm:$0xf] %vm826_vm1, %v909_v7  ;;  %v744_v10 = vadd.f32 %v1014_v9, %v1265_v24  ;;  %v708_v11 = vpop.f32.mrb[13].mxu1 }
 0x1f5   :  { %836 = vst.msk [vmem:[%s1354_s7 + $0x24] sm:$0xf] %vm826_vm1, %v907_v8  ;;  %v742_v12 = vadd.f32 %v1265_v24, %v708_v11  ;;  %v1015_v13 = vpop.f32.mrb[14].mxu1 }
 0x1f6   :  { %v760_v14 = vmax.f32 %v744_v10, 0.0  ;;  %v745_v15 = vadd.f32 %v1015_v13, %v1265_v24  ;;  %v711_v16 = vpop.f32.mrb[15].mxu1 }
 0x1f7   :  { %v758_v17 = vmax.f32 %v742_v12, 0.0  ;;  %v743_v18 = vadd.f32 %v1265_v24, %v711_v16 }
 0x1f8   :  { %v912_v19 = vpack.c.bf16 %v760_v14, %v760_v14  ;;  %v761_v20 = vmax.f32 %v745_v15, 0.0 }
 0x1f9   :  { %v910_v21 = vpack.c.bf16 %v758_v17, %v758_v17  ;;  %v759_v22 = vmax.f32 %v743_v18, 0.0 }
 0x1fa   :  { %841 = vst.msk [vmem:[%s1354_s7 + $0x38] sm:$0xf] %vm826_vm1, %v912_v19  ;;  %v913_v23 = vpack.c.bf16 %v761_v20, %v761_v20 }
 0x1fb   :  { %839 = vst.msk [vmem:[%s1354_s7 + $0x30] sm:$0xf] %vm826_vm1, %v910_v21  ;;  %v911_v25 = vpack.c.bf16 %v759_v22, %v759_v22 }
 0x1fc   :  { %842 = vst.msk [vmem:[%s1354_s7 + $0x3c] sm:$0xf] %vm826_vm1, %v913_v23 }
 0x1fd   :  { %840 = vst.msk [vmem:[%s1354_s7 + $0x34] sm:$0xf] %vm826_vm1, %v911_v25 }

</bundles_post_ra>
